<compile_context>
chip_gen: v7x
topology: tpu7x:2x2x1
jax: 0.10.0
libtpu: 0.0.40
codegen_flags: <defaults>
</compile_context>

<pallas_src>
import functools

import jax
import jax.numpy as jnp
from jax.experimental import pallas as pl
from jax.experimental.pallas import tpu as pltpu

K = 3  # conv kernel size (fixed by the module: ksize=3, stride=1, padding=1)


def _round_up(x, m):
    return (x + m - 1) // m * m


def unit_block_kernel(x_ref, w_ref, b_ref, o_ref, *, wp):
    # x_ref: (Btile, Cpp, Lin)   f32 flattened zero-padded [t, relu(x)] images;
    #                            Cpp = channels padded to a multiple of 8,
    #                            Lin  = lane length padded to a multiple of 128.
    # w_ref: (Cout, K*K*Cpp)     bf16 im2col weight, column = (dh*K+dw)*Cpp + c.
    # b_ref: (Cout, 1)           f32 bias.
    # o_ref: (Btile, Cout, Npad) f32; Npad multiple of 128. Columns with
    #                            (p mod wp) >= W or p >= H*wp are garbage and
    #                            are cropped by the wrapper.
    btile, cpp, _ = x_ref.shape
    npad = o_ref.shape[2]

    w = w_ref[...]                              # (Cout, K*K*Cpp) bf16, loaded once
    bias = b_ref[...].astype(jnp.float32)       # (Cout, 1), broadcasts over lanes

    for b in range(btile):                      # static, unrolled
        xflat = x_ref[b]                        # (Cpp, Lin) single lane-dense load
        taps = []
        for dh in range(K):
            for dw in range(K):
                s = dh * wp + dw                # static lane shift for this tap
                taps.append(jax.lax.slice(xflat, (0, s), (cpp, s + npad)))
        # im2col patch: f32 sublane-aligned concat (chunks of Cpp=8 rows), one
        # cast to bf16, then a single MXU matmul with contraction depth K*K*Cpp.
        patch = jnp.concatenate(taps, axis=0).astype(jnp.bfloat16)   # (K*K*Cpp, Npad)
        out = jnp.dot(w, patch, preferred_element_type=jnp.float32)  # (Cout, Npad)
        o_ref[b] = (out + bias).astype(o_ref.dtype)                  # bias added once


@jax.jit
def unit_block_forward(t, x, weight, bias):
    """t: scalar, x: (B, C, H, W) NCHW f32, weight: (Cout, C+1, K, K), bias: (Cout,)."""
    B, C, H, W = x.shape
    Cout = weight.shape[0]
    Cp = C + 1
    Cpp = _round_up(Cp, 8)                     # channel pad -> tile-aligned concat
    WP = W + 2                                 # padded row stride
    N = H * WP                                 # real output positions (incl. 2 wrap cols/row)
    Npad = _round_up(N, 128)                   # lane-dense output slab
    Lin = _round_up((K - 1) * WP + (K - 1) + Npad, 128)   # covers max tap shift

    # Wrapper-side layout plumbing (fuses into one XLA pass): ReLU on x only (the
    # t channel is NOT activated, matching the module), concat t channel, pad
    # channels to Cpp, zero-pad spatially (padding=1), flatten rows onto lanes.
    x_relu = jnp.maximum(x, 0.0)
    tt = jnp.full((B, 1, H, W), t, dtype=x.dtype)
    ttx = jnp.concatenate([tt, x_relu], axis=1)                          # (B, Cp, H, W)
    ttx = jnp.pad(ttx, ((0, 0), (0, Cpp - Cp), (0, 0), (0, 0)))          # (B, Cpp, H, W)
    ttx = jnp.pad(ttx, ((0, 0), (0, 0), (1, 1), (1, 1)))                 # (B, Cpp, H+2, W+2)
    x_flat = ttx.reshape(B, Cpp, (H + 2) * WP)
    x_flat = jnp.pad(x_flat, ((0, 0), (0, 0), (0, Lin - (H + 2) * WP)))  # (B, Cpp, Lin)

    # PyTorch OIHW -> im2col matrix (Cout, K*K*Cpp), tap-major, bf16 MXU operand.
    w_pad = jnp.pad(weight, ((0, 0), (0, Cpp - Cp), (0, 0), (0, 0)))     # (Cout, Cpp, K, K)
    w_im2col = jnp.transpose(w_pad, (0, 2, 3, 1)).reshape(Cout, K * K * Cpp)
    w_im2col = w_im2col.astype(jnp.bfloat16)
    bias2d = bias.reshape(Cout, 1).astype(jnp.float32)

    # 2 parallel grid steps -> both v7x TensorCores busy; costs only ~0.35 us of
    # extra per-step overhead on single-TC v5e/v6e.
    GT = 2 if (B % 2 == 0 and B >= 2) else 1
    Btile = B // GT

    out_flat = pl.pallas_call(
        functools.partial(unit_block_kernel, wp=WP),
        out_shape=jax.ShapeDtypeStruct((B, Cout, Npad), x.dtype),
        grid=(GT,),
        in_specs=[
            pl.BlockSpec((Btile, Cpp, Lin), lambda i: (i, 0, 0)),
            pl.BlockSpec((Cout, K * K * Cpp), lambda i: (0, 0)),
            pl.BlockSpec((Cout, 1), lambda i: (0, 0)),
        ],
        out_specs=pl.BlockSpec((Btile, Cout, Npad), lambda i: (i, 0, 0)),
        compiler_params=pltpu.CompilerParams(dimension_semantics=("parallel",)),
    )(x_flat, w_im2col, bias2d)

    # Drop the padded tail and the 2 wrap columns per row; result is already NCHW.
    return out_flat[:, :, :N].reshape(B, Cout, H, WP)[:, :, :, :W]


def unit_block_reference(t, x, weight, bias):
    """Pure-JAX f32 reference mirroring the PyTorch UnitBlock forward."""
    B, C, H, W = x.shape
    out = jnp.maximum(x, 0.0)
    tt = jnp.full((B, 1, H, W), t, dtype=x.dtype)
    ttx = jnp.concatenate([tt, out], axis=1)
    y = jax.lax.conv_general_dilated(
        ttx, weight, window_strides=(1, 1), padding=((1, 1), (1, 1)),
        dimension_numbers=("NCHW", "OIHW", "NCHW"))
    return y + bias[None, :, None, None]


if __name__ == "__main__":
    # Small shapes consistent with UnitBlock(dim=4): x is NCHW.
    B, C, H, W = 2, 4, 16, 16
    Cout, Cp = C, C + 1

    key = jax.random.PRNGKey(0)
    kx, kw, kb, _ = jax.random.split(key, 4)
    x = jax.random.normal(kx, (B, C, H, W), dtype=jnp.float32)
    # Deterministic parameter init (shapes from nn.Conv2d(dim+1, dim, 3)).
    weight = (jax.random.normal(kw, (Cout, Cp, K, K), dtype=jnp.float32)
              * (1.0 / (Cp * K * K) ** 0.5))
    bias = jax.random.normal(kb, (Cout,), dtype=jnp.float32) * 0.1
    t = jnp.float32(0.5)
    # NOTE: t_vec in the PyTorch forward is computed but unused (dead code) -> skipped.

    out = jax.block_until_ready(unit_block_forward(t, x, weight, bias))
    ref = jax.block_until_ready(unit_block_reference(t, x, weight, bias))

    assert out.shape == (B, C, H, W), out.shape
    # bf16 MXU operands (per perf review) -> relaxed tolerance vs the f32 reference.
    assert jnp.allclose(out, ref, atol=5e-2, rtol=5e-2), float(jnp.max(jnp.abs(out - ref)))
    print("KERNEL_OK")
</pallas_src>

<mosaic_0001>
module attributes {stable_mosaic.version = 11 : i64} {
  func.func @unit_block_kernel(%arg0: i32, %arg1: memref<1x8x512xf32, #tpu.memory_space<vmem>>, %arg2: memref<4x72xbf16, #tpu.memory_space<vmem>>, %arg3: memref<4x1xf32, #tpu.memory_space<vmem>>, %arg4: memref<1x4x384xf32, #tpu.memory_space<vmem>>) attributes {dimension_semantics = [#tpu.dimension_semantics<parallel>], iteration_bounds = array<i64: 2>, scalar_prefetch = 0 : i64, scratch_operands = 0 : i64, tpu.core_type = #tpu.core_type<tc>, window_params = [{transform_indices = @transform_0, window_bounds = array<i64: 1, 8, 512>}, {pipeline_mode = #tpu.pipeline_mode<synchronous>, transform_indices = @transform_1, window_bounds = array<i64: 4, 72>}, {pipeline_mode = #tpu.pipeline_mode<synchronous>, transform_indices = @transform_2, window_bounds = array<i64: 4, 1>}, {transform_indices = @transform_3, window_bounds = array<i64: 1, 4, 384>}]} {
    %c0 = arith.constant 0 : index
    %c0_0 = arith.constant 0 : index
    %0 = vector.load %arg2[%c0, %c0_0] : memref<4x72xbf16, #tpu.memory_space<vmem>>, vector<4x72xbf16>
    %c0_1 = arith.constant 0 : index
    %c0_2 = arith.constant 0 : index
    %1 = vector.load %arg3[%c0_1, %c0_2] : memref<4x1xf32, #tpu.memory_space<vmem>>, vector<4x1xf32>
    %c0_3 = arith.constant 0 : index
    %c0_4 = arith.constant 0 : index
    %c0_5 = arith.constant 0 : index
    %2 = vector.load %arg1[%c0_3, %c0_4, %c0_5] : memref<1x8x512xf32, #tpu.memory_space<vmem>>, vector<1x8x512xf32>
    %3 = vector.shape_cast %2 : vector<1x8x512xf32> to vector<8x512xf32>
    %4 = vector.extract_strided_slice %3 {offsets = [0, 0], sizes = [8, 384], strides = [1, 1]} : vector<8x512xf32> to vector<8x384xf32>
    %5 = vector.extract_strided_slice %3 {offsets = [0, 1], sizes = [8, 384], strides = [1, 1]} : vector<8x512xf32> to vector<8x384xf32>
    %6 = vector.extract_strided_slice %3 {offsets = [0, 2], sizes = [8, 384], strides = [1, 1]} : vector<8x512xf32> to vector<8x384xf32>
    %7 = vector.extract_strided_slice %3 {offsets = [0, 18], sizes = [8, 384], strides = [1, 1]} : vector<8x512xf32> to vector<8x384xf32>
    %8 = vector.extract_strided_slice %3 {offsets = [0, 19], sizes = [8, 384], strides = [1, 1]} : vector<8x512xf32> to vector<8x384xf32>
    %9 = vector.extract_strided_slice %3 {offsets = [0, 20], sizes = [8, 384], strides = [1, 1]} : vector<8x512xf32> to vector<8x384xf32>
    %10 = vector.extract_strided_slice %3 {offsets = [0, 36], sizes = [8, 384], strides = [1, 1]} : vector<8x512xf32> to vector<8x384xf32>
    %11 = vector.extract_strided_slice %3 {offsets = [0, 37], sizes = [8, 384], strides = [1, 1]} : vector<8x512xf32> to vector<8x384xf32>
    %12 = vector.extract_strided_slice %3 {offsets = [0, 38], sizes = [8, 384], strides = [1, 1]} : vector<8x512xf32> to vector<8x384xf32>
    %13 = tpu.concatenate %4, %5, %6, %7, %8, %9, %10, %11, %12 in 0 : vector<8x384xf32>, vector<8x384xf32>, vector<8x384xf32>, vector<8x384xf32>, vector<8x384xf32>, vector<8x384xf32>, vector<8x384xf32>, vector<8x384xf32>, vector<8x384xf32> -> vector<72x384xf32>
    %14 = arith.truncf %13 : vector<72x384xf32> to vector<72x384xbf16>
    %cst = arith.constant dense<0.000000e+00> : vector<4x384xf32>
    %15 = tpu.matmul %0, %14, %cst {dimension_numbers = #tpu.dot_dimension_numbers<[1], [0], [0], [1], [0, 0, 1, 1], [], []>} : vector<4x72xbf16>, vector<72x384xbf16>, vector<4x384xf32> -> vector<4x384xf32>
    %16 = vector.broadcast %1 : vector<4x1xf32> to vector<4x384xf32>
    %17 = arith.addf %15, %16 : vector<4x384xf32>
    %c0_6 = arith.constant 0 : index
    %c0_7 = arith.constant 0 : index
    %c0_8 = arith.constant 0 : index
    %18 = vector.load %arg4[%c0_6, %c0_7, %c0_8] : memref<1x4x384xf32, #tpu.memory_space<vmem>>, vector<1x4x384xf32>
    %19 = vector.shape_cast %18 : vector<1x4x384xf32> to vector<4x384xf32>
    %20 = vector.shape_cast %17 : vector<4x384xf32> to vector<1x4x384xf32>
    tpu.vector_store %arg4[%c0_6, %c0_7, %c0_8], %20 {strides = array<i32>} : memref<1x4x384xf32, #tpu.memory_space<vmem>>, vector<1x4x384xf32>,
    return
  }
  func.func @transform_0(%arg0: i32) -> (i32, i32, i32) {
    %c0_i32 = arith.constant 0 : i32
    %c0_i32_0 = arith.constant 0 : i32
    %c0_i32_1 = arith.constant 0 : i32
    return %arg0, %c0_i32, %c0_i32_0 : i32, i32, i32
  }
  func.func @transform_1(%arg0: i32) -> (i32, i32) {
    %c0_i32 = arith.constant 0 : i32
    %c0_i32_0 = arith.constant 0 : i32
    %c0_i32_1 = arith.constant 0 : i32
    return %c0_i32, %c0_i32_0 : i32, i32
  }
  func.func @transform_2(%arg0: i32) -> (i32, i32) {
    %c0_i32 = arith.constant 0 : i32
    %c0_i32_0 = arith.constant 0 : i32
    %c0_i32_1 = arith.constant 0 : i32
    return %c0_i32, %c0_i32_0 : i32, i32
  }
  func.func @transform_3(%arg0: i32) -> (i32, i32, i32) {
    %c0_i32 = arith.constant 0 : i32
    %c0_i32_0 = arith.constant 0 : i32
    %c0_i32_1 = arith.constant 0 : i32
    return %arg0, %c0_i32, %c0_i32_0 : i32, i32, i32
  }
}

</mosaic_0001>

<bundles_post_ra>
// kernel: unit_block_forward.1
= control target key start
LH: loop header
LB: loop body
LE: loop exit
PB: predicated region body
PF: predicated region fallthrough
CT: control target
= control target key end

     0   :  { %s648_s12 = smov 0   ;;  %s712_s0 = inlined_call_operand.vmem [shape: f32[2,8,512], index: 0, kind: input, shape index: {}]   ;;  %s713_s1 = inlined_call_operand.vmem [shape: bf16[4,72], index: 1, kind: input, shape index: {}]   ;;  %s714_s2 = inlined_call_operand.vmem [shape: f32[4,1], index: 2, kind: input, shape index: {}]   ;;  %s715_s3 = inlined_call_operand.vmem [shape: f32[2,4,384], index: 3, kind: output, shape index: {}]  }
   0x1 LB: > { %s478_s13 = sadd.s32 4294967295, %s615_s12   ;;  %p482_p0 = scmp.ge.s32.totalorder %s615_s12, 1  ;;  %s615_s12 = sphi %s648_s12, %s13_s12  }
   0x2   : > { %p137_p1 = scmp.lt.s32.totalorder %s615_s12, 3 }
   0x4   : > { %p138_p2 = pnand %p482_p0, %p137_p1 }
   0x5   : > { %p161_p3 = scmp.lt.s32.totalorder (!%p138_p2), %s478_s13, 1  ;;  %v617_v0 = vmov (!%p138_p2), 0.0   ;;  %s618_s18 = smov (!%p138_p2), 126   ;;  %v625_v7 = vmov (!%p138_p2), 0   ;;  %vm626_vm0 = vmmov (!%p138_p2), 0   ;;  %vm190_vm1 = vcmask (!%p138_p2), 1039360  }
   0x6   : > { %141 = sbr.rel (%p138_p2) target bundleno = 389 (0x185), region = 32  ;;  %498 = vmatprep.subr.bf16.mxu1 (!%p138_p2), %v617_v0  ;;  %s619_s19 = smov (!%p138_p2), 127   ;;  %368 = vmatprep.mubr.bf16.mxu0 (!%p138_p2), %v625_v7  ;;  %v173_v9 = vld [vmem:[%s714_s2] sm:$0xf] (!%p138_p2)  ;;  %vm205_vm2 = vcmask (!%p138_p2), 1031168   ;;  %vm220_vm3 = vcmask (!%p138_p2), 900096  }
   0x7   : > { %s620_s20 = smov (!%p138_p2), 110   ;;  %s621_s21 = smov (!%p138_p2), 108   ;;  %607 = vset.pattern.permute.xlu1 (!%p138_p2), %v625_v7  ;;  %608 = vset.pattern.permute.xlu0 (!%p138_p2), %v625_v7  ;;  %vm235_vm4 = vcmask (!%p138_p2), 891904   ;;  %vm250_vm5 = vcmask (!%p138_p2), 883712   ;;  %vm265_vm6 = vcmask (!%p138_p2), 752640   ;;  %vm280_vm7 = vcmask (!%p138_p2), 744448  }
   0x8   : > { %s622_s22 = smov (!%p138_p2), 109   ;;  %s623_s23 = smov (!%p138_p2), 91   ;;  %508 = vmatprep.mubr.msk.bf16.mxu1 (!%p138_p2), %vm626_vm0, %v617_v0  ;;  %vm295_vm8 = vcmask (!%p138_p2), 736256   ;;  %vm326_vm9 = vcmask (!%p138_p2), 1043456   ;;  %vm322_vm10 = vcmask (!%p138_p2), 588800  }
   0x9   : > { %s624_s24 = smov (!%p138_p2), 92   ;;  %s627_s25 = smov (!%p138_p2), 90  }
   0xd   : > { %s717_s13 = smov (!%p161_p3, %s478_s13), 1 }
   0xe   : > { %s491_s14 = sshll.u32 %s717_s13, 5  ;;  %s512_s30 = smul.u32 12, %s717_s13 }
   0xf   : > { %s165_s17 = scalar_lea.vmem %s712_s0, %s491_s14 }
  0x10   : > { %v175_v1 = vld [vmem:[%s165_s17 + $0x8] sm:$0xff]  ;;  %v663_v2 = vld [vmem:[%s165_s17 + $0x10] sm:$0xff]  ;;  %v665_v3 = vld [vmem:[%s165_s17] sm:$0xff]  ;;  %s170_s6 = scalar_lea.vmem %s715_s3, %s512_s30 }
  0x11   : > { %v542_v4 = vpack.i.bf16 %v663_v2, %v175_v1  ;;  %v177_v5 = vld [vmem:[%s165_s17 + $0x18] sm:$0xff]  ;;  %v602_v8 = vpack.i.bf16 %v175_v1, %v665_v3 }
  0x12   : > { %v537_v6 = vpack.i.bf16 %v177_v5, %v665_v3 }
  0x13   : > { %543 = vrot.lane.b32.xlu1 %v542_v4, %s618_s18  ;;  %533 = vrot.lane.b32.xlu0 %v542_v4, %s619_s19 }
  0x17   : > { %548 = vrot.lane.b32.xlu1 %v542_v4, %s620_s20  ;;  %538 = vrot.lane.b32.xlu0 %v537_v6, %s619_s19 }
  0x1b   : > { %558 = vrot.lane.b32.xlu1 %v537_v6, %s620_s20  ;;  %553 = vrot.lane.b32.xlu0 %v537_v6, %s618_s18 }
  0x1f   : > { %568 = vrot.lane.b32.xlu1 %v542_v4, %s621_s21  ;;  %563 = vrot.lane.b32.xlu0 %v542_v4, %s622_s22 }
  0x23   : > { %578 = vrot.lane.b32.xlu1 %v537_v6, %s621_s21  ;;  %573 = vrot.lane.b32.xlu0 %v537_v6, %s622_s22 }
  0x27   : > { %588 = vrot.lane.b32.xlu1 %v542_v4, %s623_s23  ;;  %583 = vrot.lane.b32.xlu0 %v542_v4, %s624_s24 }
  0x2b   : > { %598 = vrot.lane.b32.xlu1 %v537_v6, %s623_s23  ;;  %593 = vrot.lane.b32.xlu0 %v537_v6, %s624_s24 }
  0x2f   : > { %603 = vrot.lane.b32.xlu0 %v602_v8, %s627_s25  ;;  %291 = vrot.lane.b32.xlu1 %v663_v2, %s627_s25 }
  0x33   : > { %293 = vrot.lane.b32.xlu0 %v177_v5, %s627_s25  ;;  %319 = vperm.xlu1 %607, %v173_v9  }
  0x85   : > { %v544_v10 = vpop.permute.xlu1 %543  ;;  %v534_v11 = vpop.permute.xlu0 %533 }
  0x86   : > { %v536_v12 = vunpack.i.h.bf16 %v534_v11  ;;  %v535_v13 = vunpack.i.l.bf16 %v534_v11  ;;  %v546_v14 = vunpack.i.h.bf16 %v544_v10  ;;  %v545_v15 = vunpack.i.l.bf16 %v544_v10 }
  0x88   : > { %v192_v16 = vsel %vm190_vm1, %v535_v13, %v536_v12  ;;  %v207_v26 = vsel %vm205_vm2, %v545_v15, %v546_v14 }
  0x89   : > { %v549_v17 = vpop.permute.xlu1 %548  ;;  %v539_v18 = vpop.permute.xlu0 %538  ;;  %v303_v19 = vpack.c.bf16 %v192_v16, %v175_v1 }
  0x8a   : > { %v551_v20 = vunpack.i.h.bf16 %v549_v17  ;;  %v550_v21 = vunpack.i.l.bf16 %v549_v17  ;;  %v541_v22 = vunpack.i.h.bf16 %v539_v18  ;;  %v540_v23 = vunpack.i.l.bf16 %v539_v18 }
  0x8b   : > { %336 = vmatprep.subr.bf16.mxu0 %v303_v19 }
  0x8c   : > { %v191_v24 = vsel %vm190_vm1, %v540_v23, %v535_v13  ;;  %v193_v25 = vsel %vm190_vm1, %v536_v12, %v541_v22  ;;  %v222_v27 = vsel %vm220_vm3, %v550_v21, %v551_v20 }
  0x8d   : > { %v559_v28 = vpop.permute.xlu1 %558  ;;  %v554_v29 = vpop.permute.xlu0 %553  ;;  %v302_v30 = vpack.c.bf16 %v191_v24, %v665_v3  ;;  %v304_v31 = vpack.c.bf16 %v193_v25, %v663_v2  ;;  %v306_v32 = vpack.c.bf16 %v222_v27, %v207_v26 }
  0x8e   : > { %v561_v33 = vunpack.i.h.bf16 %v559_v28  ;;  %v560_v34 = vunpack.i.l.bf16 %v559_v28  ;;  %v556_v35 = vunpack.i.h.bf16 %v554_v29  ;;  %v555_v36 = vunpack.i.l.bf16 %v554_v29 }
  0x8f   : > { %337 = vmatpush1.bf16.msra.mxu0 %v302_v30  ;;  %499 = vmatpush3.bf16.msra.mxu1 %v304_v31 }
  0x90   : > { %338 = vmatprep.subr.bf16.mxu0 %v306_v32  ;;  %500 = vmatprep.subr.bf16.mxu1 %v617_v0  ;;  %v206_v37 = vsel %vm205_vm2, %v555_v36, %v545_v15  ;;  %v221_v38 = vsel %vm220_vm3, %v560_v34, %v550_v21  ;;  %v208_v39 = vsel %vm205_vm2, %v546_v14, %v556_v35  ;;  %v172_v34 = vld [vmem:[%s713_s1] sm:$0x3] }
  0x91   : > { %v569_v40 = vpop.permute.xlu1 %568  ;;  %v564_v41 = vpop.permute.xlu0 %563  ;;  %v305_v42 = vpack.c.bf16 %v221_v38, %v206_v37  ;;  %v223_v43 = vsel %vm220_vm3, %v551_v20, %v561_v33 }
  0x92   : > { %v571_v44 = vunpack.i.h.bf16 %v569_v40  ;;  %v570_v45 = vunpack.i.l.bf16 %v569_v40  ;;  %v566_v46 = vunpack.i.h.bf16 %v564_v41  ;;  %v565_v47 = vunpack.i.l.bf16 %v564_v41 }
  0x93   : > { %339 = vmatpush1.bf16.msra.mxu0 %v305_v42  ;;  %v307_v48 = vpack.c.bf16 %v223_v43, %v208_v39 }
  0x94   : > { %v237_v49 = vsel %vm235_vm4, %v565_v47, %v566_v46  ;;  %v252_v50 = vsel %vm250_vm5, %v570_v45, %v571_v44 }
  0x95   : > { %501 = vmatpush3.bf16.msra.mxu1 %v307_v48  ;;  %v579_v51 = vpop.permute.xlu1 %578  ;;  %v574_v52 = vpop.permute.xlu0 %573  ;;  %v309_v53 = vpack.c.bf16 %v252_v50, %v237_v49 }
  0x96   : > { %v581_v54 = vunpack.i.h.bf16 %v579_v51  ;;  %v580_v55 = vunpack.i.l.bf16 %v579_v51  ;;  %v576_v56 = vunpack.i.h.bf16 %v574_v52  ;;  %v575_v57 = vunpack.i.l.bf16 %v574_v52  ;;  %502 = vmatprep.subr.bf16.mxu1 %v617_v0 }
  0x97   : > { %340 = vmatprep.subr.bf16.mxu0 %v309_v53 }
  0x98   : > { %v236_v58 = vsel %vm235_vm4, %v575_v57, %v565_v47  ;;  %v251_v59 = vsel %vm250_vm5, %v580_v55, %v570_v45  ;;  %v238_v60 = vsel %vm235_vm4, %v566_v46, %v576_v56  ;;  %v253_v61 = vsel %vm250_vm5, %v571_v44, %v581_v54 }
  0x99   : > { %v589_v62 = vpop.permute.xlu1 %588  ;;  %v584_v63 = vpop.permute.xlu0 %583  ;;  %v308_v1 = vpack.c.bf16 %v251_v59, %v236_v58  ;;  %v310_v2 = vpack.c.bf16 %v253_v61, %v238_v60 }
  0x9a   : > { %v591_v3 = vunpack.i.h.bf16 %v589_v62  ;;  %v590_v4 = vunpack.i.l.bf16 %v589_v62  ;;  %v586_v5 = vunpack.i.h.bf16 %v584_v63  ;;  %v585_v6 = vunpack.i.l.bf16 %v584_v63 }
  0x9b   : > { %341 = vmatpush1.bf16.msra.mxu0 %v308_v1  ;;  %503 = vmatpush3.bf16.msra.mxu1 %v310_v2 }
  0x9c   : > { %v267_v7 = vsel %vm265_vm6, %v585_v6, %v586_v5  ;;  %v282_v8 = vsel %vm280_vm7, %v590_v4, %v591_v3  ;;  %504 = vmatprep.subr.bf16.mxu1 %v617_v0 }
  0x9d   : > { %v599_v9 = vpop.permute.xlu1 %598  ;;  %v594_v10 = vpop.permute.xlu0 %593  ;;  %v312_v11 = vpack.c.bf16 %v282_v8, %v267_v7 }
  0x9e   : > { %v601_v12 = vunpack.i.h.bf16 %v599_v9  ;;  %v600_v13 = vunpack.i.l.bf16 %v599_v9  ;;  %v596_v14 = vunpack.i.h.bf16 %v594_v10  ;;  %v595_v15 = vunpack.i.l.bf16 %v594_v10 }
  0x9f   : > { %342 = vmatprep.subr.bf16.mxu0 %v312_v11 }
  0xa0   : > { %v266_v16 = vsel %vm265_vm6, %v595_v15, %v585_v6  ;;  %v281_v17 = vsel %vm280_vm7, %v600_v13, %v590_v4  ;;  %v268_v18 = vsel %vm265_vm6, %v586_v5, %v596_v14  ;;  %v283_v19 = vsel %vm280_vm7, %v591_v3, %v601_v12 }
  0xa1   : > { %v604_v20 = vpop.permute.xlu0 %603  ;;  %v292_v21 = vpop.permute.xlu1 %291  ;;  %v311_v22 = vpack.c.bf16 %v281_v17, %v266_v16  ;;  %v313_v23 = vpack.c.bf16 %v283_v19, %v268_v18 }
  0xa2   : > { %v606_v24 = vunpack.i.h.bf16 %v604_v20  ;;  %v605_v25 = vunpack.i.l.bf16 %v604_v20 }
  0xa3   : > { %343 = vmatpush1.bf16.msra.mxu0 %v311_v22  ;;  %505 = vmatpush3.bf16.msra.mxu1 %v313_v23 }
  0xa4   : > { %v297_v26 = vsel %vm295_vm8, %v606_v24, %v292_v21  ;;  %v296_v27 = vsel %vm295_vm8, %v605_v25, %v606_v24  ;;  %506 = vmatprep.subr.bf16.mxu1 %v617_v0 }
  0xa5   : > { %v315_v28 = vpack.c.bf16 %v297_v26, %v297_v26  ;;  %v294_v29 = vpop.permute.xlu0 %293  ;;  %v314_v30 = vpack.c.bf16 %v296_v27, %v296_v27 }
  0xa6   : > { %v298_v31 = vsel %vm295_vm8, %v292_v21, %v294_v29 }
  0xa7   : > { %v316_v32 = vpack.c.bf16 %v298_v31, %v298_v31  ;;  %486 = vmatprep.subr.msk.bf16.mxu0 %vm326_vm9, %v315_v28  ;;  %v328_v33 = vsel %vm326_vm9, %v314_v30, 0 }
  0xa8   : > { %345 = vmatpush1.bf16.msra.mxu0 %v328_v33 }
  0xa9   : > { %v334_v35 = vsel %vm326_vm9, %v316_v32, 0 }
  0xaa   : > { %507 = vmatpush3.bf16.msra.mxu1 %v334_v35 }
  0xab   : > { %487 = vmatmul.mubr.msk.bf16.vlgmr.msra.gmra.mrb[0].mxu0 %vm322_vm10, %v172_v34 }
  0xad   : > { %509 = vmatmul.mubr.msk.bf16.vlgmr.msra.gmra.mrb[0].mxu1 %vm322_vm10, %v172_v34 }
  0xb2   : > { %v320_v36 = vpop.permute.xlu1 %319 }
 0x17e   : > { %v370_v0 = vpop.f32.mrb[0].mxu0 }
 0x17f   : > { %v371_v37 = vadd.f32 %v370_v0, %v320_v36  ;;  %v372_v38 = vpop.f32.mrb[1].mxu0 }
 0x180   : > { %v373_v39 = vadd.f32 %v372_v38, %v320_v36  ;;  %v374_v40 = vpop.f32.mrb[2].mxu0  ;;  %v411_v41 = vpop.f32.mrb[0].mxu1 }
 0x181   : > { %v412_v42 = vadd.f32 %v411_v41, %v320_v36  ;;  %v375_v43 = vpop.f32.mrb[3].mxu0  ;;  %v510_v44 = vpop.f32.mrb[1].mxu1 }
 0x182   : > { %v419_v45 = vcombine.low %v371_v37, %v373_v39  ;;  %v414_v46 = vpop.f32.mrb[2].mxu1 }
 0x183   : > { %422 = vst [vmem:[%s170_s6 + $0x8] sm:$0xf] %v412_v42  ;;  %v511_v47 = vpop.f32.mrb[3].mxu1 }
 0x184   : > { %421 = vst [vmem:[%s170_s6] sm:$0xff] %v419_v45 }
 0x185 PF: > { %s13_s12 = sadd.s32 1, %s615_s12  }
 0x186   : > { %p10_p4 = scmp.ge.s32.totalorder %s13_s12, 4  }
 0x188   :  { %12 = sbr.rel (!%p10_p4) target bundleno = 1 (0x1), region = 62 }

</bundles_post_ra>
